<compile_context>
chip_gen: v5e
topology: v5e:2x2
jax: 0.10.0
libtpu: 0.0.40
codegen_flags: <defaults>
</compile_context>

<pallas_src>
import functools

import jax
import jax.numpy as jnp
from jax.experimental import pallas as pl
from jax.experimental.pallas import tpu as pltpu


def _ce_partial_kernel(tgt_ref, logits_ref, out_ref, acc_ref, *,
                       total_rows, tile_rows, steps_per_shard, max_tile,
                       resident_targets):
    s = pl.program_id(0)                     # shard (parallel across TCs)
    j = pl.program_id(1)                     # tile within shard (reduction)
    n_j = pl.num_programs(1)

    @pl.when(j == 0)
    def _():
        acc_ref[...] = jnp.zeros_like(acc_ref)

    logits = logits_ref[...].astype(jnp.float32)          # (TB, C)
    tb, c = logits.shape

    # Global row indices of this (unclamped) tile. Remainder rows and fully
    # padded shard steps are masked ONLY at the accumulator below: the select
    # there blocks any NaN/Inf produced by garbage rows, and all ops before it
    # (max/exp/log, gather) are strictly per-row, so garbage cannot leak into
    # valid rows. No full-tile pre-mask is needed.
    tile_idx = s * steps_per_shard + j
    rows = tile_idx * tile_rows + jax.lax.broadcasted_iota(
        jnp.int32, (tb, 1), dimension=0)
    row_mask = rows < total_rows                          # (TB, 1) bool

    # Numerically stable log-sum-exp along the class (lane) axis.
    m = jnp.max(logits, axis=-1, keepdims=True)           # (TB, 1)
    lse = jnp.log(jnp.sum(jnp.exp(logits - m), axis=-1, keepdims=True)) + m

    # Targets for this tile: sliced from the resident (padded) array, or taken
    # from the per-tile streamed block.
    if resident_targets:
        safe_tile = jnp.minimum(tile_idx, max_tile)       # keep slice in-bounds
        start = pl.multiple_of(safe_tile * tile_rows, tile_rows)
        tgt = tgt_ref[pl.ds(start, tile_rows), :]         # (TB, 1) int32
    else:
        tgt = tgt_ref[...]                                # (TB, 1) int32

    # Gather the target logit with a select + lane-sum (no one-hot multiply).
    cols = jax.lax.broadcasted_iota(jnp.int32, (tb, c), dimension=1)
    tgt_logit = jnp.sum(jnp.where(cols == tgt, logits, 0.0),
                        axis=-1, keepdims=True)           # (TB, 1)

    # Per-example CE, masked here (essential), accumulated per shard.
    acc_ref[...] += jnp.where(row_mask, lse - tgt_logit, 0.0)

    # Flush this shard's partial CE sum on its last tile.
    @pl.when(j == n_j - 1)
    def _():
        shard_sum = jnp.sum(acc_ref[...])
        out_ref[...] = jnp.full(out_ref.shape, shard_sum, dtype=out_ref.dtype)


def _sublane_multiple(dtype):
    # Min second-to-last-dim multiple for the dtype's packed sublane layout.
    return max(8, 32 // jnp.dtype(dtype).itemsize)        # f32:8, bf16:16, i8:32


def _vmem_params():
    """(vmem_limit_bytes, double-buffered logits budget), generation-aware."""
    try:
        phys = pltpu.get_tpu_info().vmem_capacity_bytes
    except Exception:
        phys = 64 * 1024 * 1024
    if phys >= 96 * 1024 * 1024:           # v5e / v6e: 128 MiB physical VMEM
        return 64 * 1024 * 1024, 40 * 1024 * 1024
    else:                                  # v7x: 64 MiB physical per TC
        return 48 * 1024 * 1024, 32 * 1024 * 1024


def _pick_tile_rows(total_rows, num_classes, itemsize, sub, logits_budget_bytes):
    """Largest sublane-multiple row tile whose double-buffered logits block
    fits the byte budget (row ceiling 4096 so intermediates stay modest)."""
    rows_pad = max(sub, ((total_rows + sub - 1) // sub) * sub)
    per_buffer = logits_budget_bytes // 2                  # pipeline double-buffers
    by_budget = max(sub, per_buffer // max(1, num_classes * itemsize))
    tb = min(4096, rows_pad, by_budget)
    return max(sub, (tb // sub) * sub)


def flooding_loss(logits, targets, flooding, *, tile_rows=None, num_shards=1,
                  resident_targets=None):
    """Equivalent of FloodingLoss(flooding, CrossEntropyLoss())(logits, targets)."""
    b, c = logits.shape
    itemsize = jnp.dtype(logits.dtype).itemsize
    sub = _sublane_multiple(logits.dtype)
    vmem_limit, logits_budget = _vmem_params()

    if tile_rows is None:
        tile_rows = _pick_tile_rows(b, c, itemsize, sub, logits_budget)
    else:
        tile_rows = max(sub, (tile_rows // sub) * sub)

    total_tiles = pl.cdiv(b, tile_rows)
    num_shards = max(1, min(num_shards, total_tiles))
    steps_per_shard = pl.cdiv(total_tiles, num_shards)
    max_tile = total_tiles - 1

    # Zero-pad targets to a whole number of tiles so every in-kernel slice /
    # streamed block is in-bounds; padded rows are masked inside the kernel.
    b_pad = total_tiles * tile_rows
    tgt2d = jnp.pad(targets.astype(jnp.int32), (0, b_pad - b)).reshape(b_pad, 1)

    # Resident targets avoid a per-step DMA, but a (b_pad, 1) VMEM block is
    # lane-padded to 128 lanes (b_pad * 512 B) — only keep it resident if small.
    if resident_targets is None:
        resident_targets = b_pad * 512 <= 4 * 1024 * 1024

    def tile_map(s, j):
        # Clamp padded shard steps onto a valid tile; those rows get fully
        # masked out inside the kernel by the global-row mask.
        return (jnp.minimum(s * steps_per_shard + j, max_tile), 0)

    if resident_targets:
        tgt_spec = pl.BlockSpec((b_pad, 1), lambda s, j: (0, 0))   # one-shot DMA
    else:
        tgt_spec = pl.BlockSpec((tile_rows, 1), tile_map)          # streamed

    kernel = functools.partial(
        _ce_partial_kernel,
        total_rows=b, tile_rows=tile_rows, steps_per_shard=steps_per_shard,
        max_tile=max_tile, resident_targets=resident_targets)

    partials = pl.pallas_call(
        kernel,
        out_shape=jax.ShapeDtypeStruct((num_shards, 8, 128), jnp.float32),
        grid_spec=pltpu.PrefetchScalarGridSpec(
            num_scalar_prefetch=0,
            grid=(num_shards, steps_per_shard),
            in_specs=[
                tgt_spec,                                   # targets
                pl.BlockSpec((tile_rows, c), tile_map),     # streamed logits
            ],
            out_specs=pl.BlockSpec((1, 8, 128), lambda s, j: (s, 0, 0)),
            scratch_shapes=[pltpu.VMEM((tile_rows, 1), jnp.float32)],
        ),
        compiler_params=pltpu.CompilerParams(
            dimension_semantics=("parallel", "arbitrary"),
            vmem_limit_bytes=vmem_limit),
    )(tgt2d, logits)

    # Tiny scalar epilogue: combine shard partials, mean over the true batch,
    # then the flooding transform.
    ce = jnp.sum(partials[:, 0, 0]) / b
    return jnp.abs(ce - flooding) + flooding


def _reference(logits, targets, flooding):
    logits = logits.astype(jnp.float32)
    logp = jax.nn.log_softmax(logits, axis=-1)
    ce = -jnp.mean(logp[jnp.arange(logits.shape[0]), targets])
    return jnp.abs(ce - flooding) + flooding


if __name__ == "__main__":
    key = jax.random.PRNGKey(0)
    # Small shapes; B deliberately not a multiple of the tile so the remainder
    # masking, multi-tile accumulation and shard padding paths are exercised.
    B, C = 20, 32
    k1, k2 = jax.random.split(key)
    logits = jax.random.normal(k1, (B, C), dtype=jnp.float32)
    targets = jax.random.randint(k2, (B,), 0, C, dtype=jnp.int32)
    flooding = 0.5

    ref = _reference(logits, targets, flooding)

    # 1) Default path: auto tile sizing, single shard, resident targets.
    out = jax.block_until_ready(flooding_loss(logits, targets, flooding))
    assert jnp.allclose(out, ref, atol=1e-5, rtol=1e-5), (out, ref)

    # 2) Small tiles + 2 shards: exercises remainder masking, multi-tile
    #    accumulation and padded (clamped) shard steps.
    out = jax.block_until_ready(
        flooding_loss(logits, targets, flooding, tile_rows=8, num_shards=2))
    assert jnp.allclose(out, ref, atol=1e-5, rtol=1e-5), (out, ref)

    # 3) Streamed-targets path (forced), small tiles.
    out = jax.block_until_ready(
        flooding_loss(logits, targets, flooding, tile_rows=8,
                      resident_targets=False))
    assert jnp.allclose(out, ref, atol=1e-5, rtol=1e-5), (out, ref)

    # 4) bf16 logits: exercises the multiple-of-16 sublane rounding and the
    #    in-register f32 upcast.
    logits_bf16 = logits.astype(jnp.bfloat16)
    out = jax.block_until_ready(flooding_loss(logits_bf16, targets, flooding))
    ref_bf16 = _reference(logits_bf16, targets, flooding)
    assert jnp.allclose(out, ref_bf16, atol=1e-5, rtol=1e-5), (out, ref_bf16)

    print("KERNEL_OK")
</pallas_src>

<mosaic_0001>
module attributes {stable_mosaic.version = 11 : i64} {
  func.func @_ce_partial_kernel(%arg0: i32, %arg1: i32, %arg2: memref<24x1xi32, #tpu.memory_space<vmem>>, %arg3: memref<24x32xf32, #tpu.memory_space<vmem>>, %arg4: memref<1x8x128xf32, #tpu.memory_space<vmem>>, %arg5: memref<24x1xf32, #tpu.memory_space<vmem>>) attributes {dimension_semantics = [#tpu.dimension_semantics<parallel>, #tpu.dimension_semantics<arbitrary>], iteration_bounds = array<i64: 1, 1>, scalar_prefetch = 0 : i64, scratch_operands = 1 : i64, tpu.core_type = #tpu.core_type<tc>, window_params = [{pipeline_mode = #tpu.pipeline_mode<synchronous>, transform_indices = @transform_0, window_bounds = array<i64: 24, 1>}, {transform_indices = @transform_1, window_bounds = array<i64: 24, 32>}, {transform_indices = @transform_2, window_bounds = array<i64: 1, 8, 128>}]} {
    %c0_i32 = arith.constant 0 : i32
    %0 = arith.cmpi eq, %arg1, %c0_i32 : i32
    %1 = arith.extui %0 : i1 to i32
    %c0_i32_0 = arith.constant 0 : i32
    %2 = arith.cmpi ne, %1, %c0_i32_0 : i32
    scf.if %2 {
      %cst_15 = arith.constant 0.000000e+00 : f32
      %42 = vector.broadcast %cst_15 : f32 to vector<24x1xf32>
      %c0_16 = arith.constant 0 : index
      %c0_17 = arith.constant 0 : index
      %43 = vector.load %arg5[%c0_16, %c0_17] : memref<24x1xf32, #tpu.memory_space<vmem>>, vector<24x1xf32>
      tpu.vector_store %arg5[%c0_16, %c0_17], %42 {strides = array<i32>} : memref<24x1xf32, #tpu.memory_space<vmem>>, vector<24x1xf32>,
    } else {
    }
    %c0 = arith.constant 0 : index
    %c0_1 = arith.constant 0 : index
    %3 = vector.load %arg3[%c0, %c0_1] : memref<24x32xf32, #tpu.memory_space<vmem>>, vector<24x32xf32>
    %c1_i32 = arith.constant 1 : i32
    %4 = arith.muli %arg0, %c1_i32 : i32
    %5 = arith.addi %4, %arg1 : i32
    %c24_i32 = arith.constant 24 : i32
    %6 = arith.muli %5, %c24_i32 : i32
    %7 = tpu.iota {dimensions = array<i32: 0>} : vector<24x1xi32>
    %8 = vector.broadcast %6 : i32 to vector<24x1xi32>
    %9 = arith.addi %8, %7 : vector<24x1xi32>
    %c20_i32 = arith.constant 20 : i32
    %10 = vector.broadcast %c20_i32 : i32 to vector<24x1xi32>
    %11 = arith.cmpi slt, %9, %10 : vector<24x1xi32>
    %cst = arith.constant dense<0xFF800000> : vector<24xf32>
    %12 = vector.multi_reduction <maximumf>, %3, %cst [1] : vector<24x32xf32> to vector<24xf32>
    %13 = vector.shape_cast %12 : vector<24xf32> to vector<24x1xf32>
    %14 = vector.broadcast %13 : vector<24x1xf32> to vector<24x32xf32>
    %15 = arith.subf %3, %14 : vector<24x32xf32>
    %16 = math.exp %15 : vector<24x32xf32>
    %cst_2 = arith.constant dense<0.000000e+00> : vector<24xf32>
    %17 = vector.multi_reduction <add>, %16, %cst_2 [1] : vector<24x32xf32> to vector<24xf32>
    %18 = vector.shape_cast %17 : vector<24xf32> to vector<24x1xf32>
    %19 = math.log %18 : vector<24x1xf32>
    %20 = arith.addf %19, %13 : vector<24x1xf32>
    %c0_i32_3 = arith.constant 0 : i32
    %21 = arith.minsi %5, %c0_i32_3 : i32
    %c24_i32_4 = arith.constant 24 : i32
    %22 = arith.muli %21, %c24_i32_4 : i32
    %23 = tpu.assume_multiple %22, 24 : i32
    %24 = arith.index_cast %23 : i32 to index
    %c0_5 = arith.constant 0 : index
    %25 = vector.load %arg2[%24, %c0_5] : memref<24x1xi32, #tpu.memory_space<vmem>>, vector<24x1xi32>
    %26 = tpu.iota {dimensions = array<i32: 1>} : vector<24x32xi32>
    %27 = vector.broadcast %25 : vector<24x1xi32> to vector<24x32xi32>
    %28 = arith.cmpi eq, %26, %27 : vector<24x32xi32>
    %cst_6 = arith.constant 0.000000e+00 : f32
    %29 = vector.broadcast %cst_6 : f32 to vector<24x32xf32>
    %30 = arith.select %28, %3, %29 : vector<24x32xi1>, vector<24x32xf32>
    %cst_7 = arith.constant dense<0.000000e+00> : vector<24xf32>
    %31 = vector.multi_reduction <add>, %30, %cst_7 [1] : vector<24x32xf32> to vector<24xf32>
    %32 = vector.shape_cast %31 : vector<24xf32> to vector<24x1xf32>
    %c0_8 = arith.constant 0 : index
    %c0_9 = arith.constant 0 : index
    %33 = vector.load %arg5[%c0_8, %c0_9] : memref<24x1xf32, #tpu.memory_space<vmem>>, vector<24x1xf32>
    %34 = arith.subf %20, %32 : vector<24x1xf32>
    %cst_10 = arith.constant 0.000000e+00 : f32
    %35 = vector.broadcast %cst_10 : f32 to vector<24x1xf32>
    %36 = arith.select %11, %34, %35 : vector<24x1xi1>, vector<24x1xf32>
    %37 = arith.addf %33, %36 : vector<24x1xf32>
    %c0_11 = arith.constant 0 : index
    %c0_12 = arith.constant 0 : index
    %38 = vector.load %arg5[%c0_11, %c0_12] : memref<24x1xf32, #tpu.memory_space<vmem>>, vector<24x1xf32>
    tpu.vector_store %arg5[%c0_11, %c0_12], %37 {strides = array<i32>} : memref<24x1xf32, #tpu.memory_space<vmem>>, vector<24x1xf32>,
    %c0_i32_13 = arith.constant 0 : i32
    %39 = arith.cmpi eq, %arg1, %c0_i32_13 : i32
    %40 = arith.extui %39 : i1 to i32
    %c0_i32_14 = arith.constant 0 : i32
    %41 = arith.cmpi ne, %40, %c0_i32_14 : i32
    scf.if %41 {
      %c0_15 = arith.constant 0 : index
      %c0_16 = arith.constant 0 : index
      %42 = vector.load %arg5[%c0_15, %c0_16] : memref<24x1xf32, #tpu.memory_space<vmem>>, vector<24x1xf32>
      %43 = vector.shape_cast %42 : vector<24x1xf32> to vector<1x24x1xf32>
      %cst_17 = arith.constant dense<0.000000e+00> : vector<1xf32>
      %44 = vector.multi_reduction <add>, %43, %cst_17 [1, 2] : vector<1x24x1xf32> to vector<1xf32>
      %45 = vector.shape_cast %44 : vector<1xf32> to vector<1x1x1xf32>
      %46 = vector.extract %45[0, 0, 0] : f32 from vector<1x1x1xf32>
      %47 = vector.broadcast %46 : f32 to vector<1x8x128xf32>
      %c0_18 = arith.constant 0 : index
      %c0_19 = arith.constant 0 : index
      %c0_20 = arith.constant 0 : index
      %48 = vector.load %arg4[%c0_18, %c0_19, %c0_20] : memref<1x8x128xf32, #tpu.memory_space<vmem>>, vector<1x8x128xf32>
      tpu.vector_store %arg4[%c0_18, %c0_19, %c0_20], %47 {strides = array<i32>} : memref<1x8x128xf32, #tpu.memory_space<vmem>>, vector<1x8x128xf32>,
    } else {
    }
    return
  }
  func.func @transform_0(%arg0: i32, %arg1: i32) -> (i32, i32) {
    %c0_i32 = arith.constant 0 : i32
    %c0_i32_0 = arith.constant 0 : i32
    %c0_i32_1 = arith.constant 0 : i32
    return %c0_i32, %c0_i32_0 : i32, i32
  }
  func.func @transform_1(%arg0: i32, %arg1: i32) -> (i32, i32) {
    %c1_i32 = arith.constant 1 : i32
    %0 = arith.muli %arg0, %c1_i32 : i32
    %1 = arith.addi %0, %arg1 : i32
    %c0_i32 = arith.constant 0 : i32
    %2 = arith.minsi %1, %c0_i32 : i32
    %c0_i32_0 = arith.constant 0 : i32
    %c0_i32_1 = arith.constant 0 : i32
    return %2, %c0_i32_0 : i32, i32
  }
  func.func @transform_2(%arg0: i32, %arg1: i32) -> (i32, i32, i32) {
    %c0_i32 = arith.constant 0 : i32
    %c0_i32_0 = arith.constant 0 : i32
    %c0_i32_1 = arith.constant 0 : i32
    return %arg0, %c0_i32, %c0_i32_0 : i32, i32, i32
  }
}

</mosaic_0001>

<bundles_post_ra>
// kernel: tpu_custom_call.1
= control target key start
LH: loop header
LB: loop body
LE: loop exit
PB: predicated region body
PF: predicated region fallthrough
CT: control target
= control target key end

     0   :  { %vm68_vm0 = vcmask 261120   ;;  %v246_v4 = vmov 0   ;;  %s303_s0 = inlined_call_operand.vmem [shape: s32[24,1], index: 0, kind: input, shape index: {}]   ;;  %s304_s1 = inlined_call_operand.vmem [shape: f32[20,32], index: 1, kind: input, shape index: {}]   ;;  %s305_s2 = inlined_call_operand.hbm [shape: f32[1,8,128], index: 2, kind: output, shape index: {}]  }
   0x1   :  { %v52_v0 = vld [vmem:[%s304_s1] sm:$0xff]  ;;  %v54_v1 = vld [vmem:[%s304_s1 + $0x10] sm:$0xff]  ;;  %205 = vset.pattern.permute.xlu1 %v246_v4  ;;  %206 = vset.pattern.permute.xlu2 %v246_v4  ;;  %v110_v5 = vld [vmem:[%s303_s0 + $0x8] sm:$0xff] }
   0x2   :  { %v69_v2 = vsel %vm68_vm0, %v52_v0, -inf  ;;  %v75_v3 = vsel %vm68_vm0, %v54_v1, -inf }
   0x3   :  { %70 = vmax.xlane.f32.xlu0 %v69_v2  ;;  %76 = vmax.xlane.f32.xlu1 %v75_v3 }
   0x4   :  { %7 = vsyncpa [#allocation4], 0  ;;  %118 = vperm.xlu2 %206, %v110_v5   ;;  %207 = vset.pattern.permute.xlu0 %v246_v4  ;;  %v53_v6 = vld [vmem:[%s304_s1 + $0x8] sm:$0xff]  ;;  %v111_v8 = vld [vmem:[%s303_s0 + $0x10] sm:$0xff]  ;;  %v57_v10 = vlaneseq  ;;  %vm48_vm4 = vcmask 7168   ;;  %v247_v36 = vmov 0.0  }
   0x5   :  { %v72_v7 = vsel %vm68_vm0, %v53_v6, -inf  ;;  %v109_v9 = vld [vmem:[%s303_s0] sm:$0xff]  ;;  %50 = vst.msk [vmem:[#allocation2 + $0x8] sm:$0xff] %vm48_vm4, %v247_v36  ;;  %s248_s0 = smov [#allocation3]   ;;  %s183_s23 = sshll.u32 %s305_s2, 4  ;;  %s184_s23 = int_to_ptr.hbm [resolvable:$true] %s183_s23 }
   0x6   :  { %v113_v11 = vand.u32 127, %v57_v10  ;;  %49 = vst.msk [vmem:[#allocation2] sm:$0xff] %vm48_vm4, %v247_v36  ;;  %v58_v48 = vshrl.u32 %v57_v10, 7  ;;  %s181_s1 = sshll.u32 %s248_s0, 4  ;;  %s182_s1 = int_to_ptr.vmem [resolvable:$true] %s181_s1 }
   0x7   :  { %51 = vst.msk [vmem:[#allocation2 + $0x10] sm:$0xff] %vm48_vm4, %v247_v36 }
   0x8   :  { %v60_v56 = vadd.s32 16, %v58_v48 }
   0xa   :  { %vm67_vm5 = vcmp.lt.s32.totalorder %v60_v56, 20 }
   0xb   :  { %73 = vmax.xlane.f32.xlu0 %v72_v7 }
   0xc   :  { %121 = vperm.xlu2 %206, %v111_v8   ;;  %v139_v53 = vld [vmem:[#allocation2 + $0x8] sm:$0xff] }
   0xd   :  { %v138_v47 = vld [vmem:[#allocation2] sm:$0xff] }
   0xe   :  { %v140_v60 = vld [vmem:[#allocation2 + $0x10] sm:$0xff] }
  0x1c   :  { %115 = vperm.xlu1 %205, %v109_v9  }
  0x5e   :  { %v119_v12 = vpop.permute.xlu2 %118 }
  0x5f   :  { %vm124_vm1 = vcmp.eq.s32.totalorder %v113_v11, %v119_v12 }
  0x60   :  { %v127_v13 = vsel %vm124_vm1, %v53_v6, 0.0 }
  0x61   :  { %v132_v14 = vsel %vm68_vm0, %v127_v13, 0.0 }
  0x62   :  { %133 = vadd.xlane.f32.xlu1 %v132_v14 }
  0x66   :  { %v122_v32 = vpop.permute.xlu2 %121 }
  0x67   :  { %vm125_vm3 = vcmp.eq.s32.totalorder %v113_v11, %v122_v32 }
  0x68   :  { %v128_v34 = vsel %vm125_vm3, %v54_v1, 0.0 }
  0x69   :  { %v135_v35 = vsel %vm68_vm0, %v128_v34, 0.0 }
  0x76   :  { %v71_v15 = vpop.xlane.xlu0 %70  ;;  %v77_v16 = vpop.xlane.xlu1 %76 }
  0x77   :  { %v78_v17 = vsub.f32 %v52_v0, %v71_v15  ;;  %v80_v19 = vsub.f32 %v54_v1, %v77_v16 }
  0x79   :  { %v81_v18 = vmul.f32 1.442695, %v78_v17  ;;  %v85_v20 = vmul.f32 1.442695, %v80_v19 }
  0x7b   :  { %208 = vpow2.f32 %v81_v18 }
  0x7c   :  { %210 = vpow2.f32 %v85_v20 }
  0x7e   :  { %v74_v21 = vpop.xlane.xlu0 %73 }
  0x7f   :  { %v79_v22 = vsub.f32 %v53_v6, %v74_v21 }
  0x81   :  { %v209_v23 = vpop.eup %208  ;;  %v83_v24 = vmul.f32 1.442695, %v79_v22 }
  0x82   :  { %v87_v25 = vsel %vm68_vm0, %v209_v23, 0.0  ;;  %v211_v26 = vpop.eup %210 }
  0x83   :  { %212 = vpow2.f32 %v83_v24  ;;  %88 = vadd.xlane.f32.xlu0 %v87_v25  ;;  %v93_v28 = vsel %vm68_vm0, %v211_v26, 0.0 }
  0x89   :  { %v213_v27 = vpop.eup %212 }
  0x8a   :  { %v90_v29 = vsel %vm68_vm0, %v213_v27, 0.0 }
  0x8b   :  { %94 = vadd.xlane.f32.xlu0 %v93_v28  ;;  %91 = vadd.xlane.f32.xlu2 %v90_v29 }
  0x8e   :  { %v116_v30 = vpop.permute.xlu1 %115 }
  0x8f   :  { %vm123_vm2 = vcmp.eq.s32.totalorder %v113_v11, %v116_v30 }
  0x90   :  { %v126_v31 = vsel %vm123_vm2, %v52_v0, 0.0 }
  0x91   :  { %v129_v33 = vsel %vm68_vm0, %v126_v31, 0.0 }
  0x93   :  { %130 = vadd.xlane.f32.xlu0 %v129_v33 }
  0x9b   :  { %136 = vadd.xlane.f32.xlu0 %v135_v35 }
  0xd5   :  { %v134_v52 = vpop.xlane.xlu1 %133 }
  0xf6   :  { %v89_v37 = vpop.xlane.xlu0 %88 }
  0xf7   :  { %214 = vlog2.f32 %v89_v37 }
  0xfd   :  { %v215_v38 = vpop.eup %214 }
  0xfe   :  { %v92_v39 = vpop.xlane.xlu2 %91  ;;  %v95_v40 = vpop.xlane.xlu0 %94  ;;  %v97_v41 = vmul.f32 0.6931472, %v215_v38 }
  0xff   :  { %216 = vlog2.f32 %v92_v39 }
 0x100   :  { %218 = vlog2.f32 %v95_v40  ;;  %v102_v43 = vadd.f32 %v97_v41, %v71_v15 }
 0x105   :  { %v217_v42 = vpop.eup %216 }
 0x106   :  { %v219_v44 = vpop.eup %218  ;;  %v99_v45 = vmul.f32 0.6931472, %v217_v42  ;;  %v131_v46 = vpop.xlane.xlu0 %130 }
 0x107   :  { %v141_v49 = vsub.f32 %v102_v43, %v131_v46  ;;  %v101_v51 = vmul.f32 0.6931472, %v219_v44 }
 0x108   :  { %v103_v50 = vadd.f32 %v99_v45, %v74_v21 }
 0x109   :  { %v147_v54 = vadd.f32 %v141_v49, %v138_v47  ;;  %v104_v58 = vadd.f32 %v101_v51, %v77_v16 }
 0x10a   :  { %v142_v55 = vsub.f32 %v103_v50, %v134_v52 }
 0x10b   :  { %151 = vst.msk [vmem:[#allocation2] sm:$0xff] %vm48_vm4, %v147_v54 }
 0x10c   :  { %v148_v57 = vadd.f32 %v142_v55, %v139_v53 }
 0x10e   :  { %152 = vst.msk [vmem:[#allocation2 + $0x8] sm:$0xff] %vm48_vm4, %v148_v57  ;;  %v137_v59 = vpop.xlane.xlu0 %136 }
 0x10f   :  { %v143_v61 = vsub.f32 %v104_v58, %v137_v59 }
 0x111   :  { %v146_v62 = vsel %vm67_vm5, %v143_v61, 0.0 }
 0x112   :  { %v149_v63 = vadd.f32 %v146_v62, %v140_v60  ;;  %v157_v1 = vld [vmem:[#allocation2] sm:$0xff] }
 0x113   :  { %v160_v3 = vsel %vm48_vm4, %v157_v1, 0.0 }
 0x114   :  { %153 = vst.msk [vmem:[#allocation2 + $0x10] sm:$0xff] %vm48_vm4, %v149_v63 }
 0x115   :  { %v158_v0 = vld [vmem:[#allocation2 + $0x8] sm:$0xff] }
 0x116   :  { %v161_v2 = vsel %vm48_vm4, %v158_v0, 0.0 }
 0x117   :  { %v162_v5 = vadd.f32 %v161_v2, %v160_v3 }
 0x11b   :  { %v159_v4 = vld [vmem:[#allocation2 + $0x10] sm:$0xff] }
 0x11c   :  { %v163_v6 = vsel %vm48_vm4, %v159_v4, 0.0 }
 0x11d   :  { %v164_v7 = vadd.f32 %v163_v6, %v162_v5 }
 0x11f   :  { %165 = vadd.xlane.f32.xlu0 %v164_v7 }
 0x192   :  { %v166_v8 = vpop.xlane.xlu0 %165 }
 0x193   :  { %v167_v9 = vrot.slane %v166_v8, 4 }
 0x195   :  { %v168_v10 = vadd.f32 %v167_v9, %v166_v8 }
 0x197   :  { %v169_v11 = vrot.slane %v168_v10, 2 }
 0x199   :  { %v170_v12 = vadd.f32 %v169_v11, %v168_v10 }
 0x19b   :  { %v171_v13 = vrot.slane %v170_v12, 1 }
 0x19d   :  { %v172_v14 = vadd.f32 %v171_v13, %v170_v12 }
 0x19f   :  { %200 = vpush %v172_v14 }
 0x1d0   :  { %s201_s24 = spop %200 }
 0x1d1   :  { %v174_v15 = vstv %s201_s24 }
 0x1d2   :  { %175 = vst [vmem:[#allocation3] sm:$0xff] %v174_v15 }
 0x1d3   :  { %186 = dma.vmem_to_hbm [thread:$0]  %s182_s1, 128, %s184_s23, [#allocation4]  }
 0x1d4   :  { %244 = dma.done.wait [#allocation4], 128  }
 0x1d5   :  { %245 = vsyncadd [#allocation4], 4294967168 }
 0x1d6   :  { %191 = vsyncpa [#allocation4], 1 }

</bundles_post_ra>
